<compile_context>
chip_gen: v7x
topology: tpu7x:2x2x1
jax: 0.10.0
libtpu: 0.0.40
codegen_flags: <defaults>
</compile_context>

<pallas_src>
import functools

import jax
import jax.numpy as jnp
from jax.experimental import pallas as pl
from jax.experimental.pallas import tpu as pltpu


_ROW_ALIGN = 16  # sublane-safe batch-row alignment for f32 / bf16 tiles
# TODO(synk): raise _ROW_ALIGN to 32 if int8/fp8 activations are ever fed in.


def _round_up(x: int, m: int) -> int:
    return ((x + m - 1) // m) * m


def _ffn_kernel(x_ref, w1_ref, w2_ref, w3_ref, o_ref):
    # x_ref:  [TB, 16]   activations tile (streamed per grid step)
    # w1_ref: [16, 32]   w1.weight.T  (VMEM-resident)
    # w2_ref: [16, 32]   w2.weight.T  (VMEM-resident)
    # w3_ref: [32, 16]   out_proj.weight.T (VMEM-resident)
    # o_ref:  [TB, 16]   output tile (native width, no lane padding)
    x = x_ref[...]

    # Two MXU matmuls with f32 accumulation (avoids mid-vreg lane slicing of
    # a fused gate/value result).
    h1 = jnp.dot(x, w1_ref[...], preferred_element_type=jnp.float32)  # [TB, 32]
    h2 = jnp.dot(x, w2_ref[...], preferred_element_type=jnp.float32)  # [TB, 32]

    # SiLU in f32; sigmoid's exp / reciprocal route to the EUP slot.
    gated = (h1 * jax.nn.sigmoid(h1)) * h2                            # [TB, 32] f32

    out = jnp.dot(gated.astype(w3_ref.dtype), w3_ref[...],
                  preferred_element_type=jnp.float32)                 # [TB, 16]
    o_ref[...] = out.astype(o_ref.dtype)


def prepare_weights(w1, w2, w3):
    """One-time weight prep: PyTorch [out, in] -> pre-transposed [in, out]."""
    return w1.T, w2.T, w3.T      # [16,32], [16,32], [32,16]


@functools.partial(jax.jit, static_argnames=("tile_b",))
def toy_model_forward_prepared(x, w1_t, w2_t, w3_t, *, tile_b: int = 8192):
    """ToyModel forward with pre-transposed weights.

    x:    [B, 16]
    w1_t: [16, 32]   (= ffn.w1.weight.T)
    w2_t: [16, 32]   (= ffn.w2.weight.T)
    w3_t: [32, 16]   (= ffn.out_proj.weight.T)
    returns [B, 16]
    """
    B, d_in = x.shape
    hidden = w1_t.shape[1]      # 32
    d_out = w3_t.shape[1]       # 16
    assert w1_t.shape == (d_in, hidden) and w2_t.shape == (d_in, hidden)
    assert w3_t.shape == (hidden, d_out)

    # --- Grid-first batch tiling -------------------------------------------
    # Choose the number of grid steps first, then derive the aligned tile, so
    # padding waste is at most _ROW_ALIGN-1 rows per step.  Force >= 2 steps
    # when the batch is big enough to split, so v7x's 2nd TensorCore has work.
    steps = max(1, pl.cdiv(B, tile_b))
    if B >= 2 * _ROW_ALIGN:
        steps = max(steps, 2)
    tb = _round_up(pl.cdiv(B, steps), _ROW_ALIGN)
    padded_b = steps * tb
    if padded_b != B:
        # Padded rows compute silu(0)*0 = 0 and are sliced off below.
        x = jnp.pad(x, ((0, padded_b - B), (0, 0)))
    grid = (steps,)

    itemsize = jnp.dtype(x.dtype).itemsize
    w_bytes = (w1_t.size * jnp.dtype(w1_t.dtype).itemsize
               + w2_t.size * jnp.dtype(w2_t.dtype).itemsize
               + w3_t.size * jnp.dtype(w3_t.dtype).itemsize)
    cost = pl.CostEstimate(
        flops=2 * padded_b * d_in * hidden * 2 + 2 * padded_b * hidden * d_out,
        transcendentals=padded_b * hidden,
        bytes_accessed=(padded_b * d_in * itemsize        # x
                        + padded_b * d_out * itemsize     # out (real width)
                        + w_bytes),
    )

    # Rough VMEM footprint: double-buffered x/out DMA windows + f32 temps.
    vmem_est = 2 * tb * (d_in + d_out) * itemsize + 4 * tb * hidden * 4
    compiler_kwargs = dict(dimension_semantics=("parallel",))
    if vmem_est > 24 * 1024 * 1024:
        # Stay well under v7x's 64 MiB physical VMEM.
        compiler_kwargs["vmem_limit_bytes"] = min(int(vmem_est * 3 // 2),
                                                  48 * 1024 * 1024)

    out_padded = pl.pallas_call(
        _ffn_kernel,
        out_shape=jax.ShapeDtypeStruct((padded_b, d_out), x.dtype),
        grid_spec=pltpu.PrefetchScalarGridSpec(
            num_scalar_prefetch=0,
            grid=grid,
            in_specs=[
                pl.BlockSpec((tb, d_in), lambda i: (i, 0)),      # x streams
                pl.BlockSpec((d_in, hidden), lambda i: (0, 0)),  # VMEM-resident
                pl.BlockSpec((d_in, hidden), lambda i: (0, 0)),  # VMEM-resident
                pl.BlockSpec((hidden, d_out), lambda i: (0, 0)), # VMEM-resident
            ],
            out_specs=pl.BlockSpec((tb, d_out), lambda i: (i, 0)),
        ),
        compiler_params=pltpu.CompilerParams(**compiler_kwargs),
        cost_estimate=cost,
    )(x, w1_t, w2_t, w3_t)

    if padded_b != B:
        out_padded = out_padded[:B]
    return out_padded


def toy_model_forward(x, w1, w2, w3, *, tile_b: int = 8192):
    """Convenience entry taking PyTorch-layout weights ([out, in])."""
    w1_t, w2_t, w3_t = prepare_weights(w1, w2, w3)
    return toy_model_forward_prepared(x, w1_t, w2_t, w3_t, tile_b=tile_b)


def _init_linear_weight(key, out_features, in_features):
    # Deterministic stand-in for nn.Linear's kaiming-uniform init:
    # U(-1/sqrt(in), 1/sqrt(in)), weight shape [out, in] like PyTorch.
    bound = 1.0 / jnp.sqrt(jnp.float32(in_features))
    return jax.random.uniform(
        key, (out_features, in_features), dtype=jnp.float32,
        minval=-bound, maxval=bound)


def reference_forward(x, w1, w2, w3):
    # Pure-JAX reference matching PyTorch semantics (Linear: y = x @ W.T).
    h1 = x @ w1.T
    h2 = x @ w2.T
    return (jax.nn.silu(h1) * h2) @ w3.T


if __name__ == "__main__":
    key = jax.random.PRNGKey(0)
    k_x, k1, k2, k3 = jax.random.split(key, 4)

    B = 8  # small batch of token rows
    x = jax.random.normal(k_x, (B, 16), dtype=jnp.float32)

    # PyTorch-shaped weights: [out_features, in_features]
    w1 = _init_linear_weight(k1, 32, 16)   # ffn.w1.weight
    w2 = _init_linear_weight(k2, 32, 16)   # ffn.w2.weight
    w3 = _init_linear_weight(k3, 16, 32)   # ffn.out_proj.weight

    # Weight prep is done once, outside the hot forward path.
    w1_t, w2_t, w3_t = prepare_weights(w1, w2, w3)

    out = toy_model_forward_prepared(x, w1_t, w2_t, w3_t)
    out = jax.block_until_ready(out)

    ref = reference_forward(x, w1, w2, w3)
    assert out.shape == (B, 16), out.shape
    assert jnp.allclose(out, ref, atol=1e-5, rtol=1e-5), (
        float(jnp.max(jnp.abs(out - ref))))

    print("KERNEL_OK")
</pallas_src>

<mosaic_0001>
module attributes {stable_mosaic.version = 11 : i64} {
  func.func @_ffn_kernel(%arg0: i32, %arg1: memref<16x16xf32, #tpu.memory_space<vmem>>, %arg2: memref<16x32xf32, #tpu.memory_space<vmem>>, %arg3: memref<16x32xf32, #tpu.memory_space<vmem>>, %arg4: memref<32x16xf32, #tpu.memory_space<vmem>>, %arg5: memref<16x16xf32, #tpu.memory_space<vmem>>) attributes {dimension_semantics = [#tpu.dimension_semantics<parallel>], iteration_bounds = array<i64: 1>, scalar_prefetch = 0 : i64, scratch_operands = 0 : i64, tpu.core_type = #tpu.core_type<tc>, window_params = [{transform_indices = @transform_0, window_bounds = array<i64: 16, 16>}, {pipeline_mode = #tpu.pipeline_mode<synchronous>, transform_indices = @transform_1, window_bounds = array<i64: 16, 32>}, {pipeline_mode = #tpu.pipeline_mode<synchronous>, transform_indices = @transform_2, window_bounds = array<i64: 16, 32>}, {pipeline_mode = #tpu.pipeline_mode<synchronous>, transform_indices = @transform_3, window_bounds = array<i64: 32, 16>}, {transform_indices = @transform_4, window_bounds = array<i64: 16, 16>}]} {
    %c0 = arith.constant 0 : index
    %c0_0 = arith.constant 0 : index
    %0 = vector.load %arg1[%c0, %c0_0] : memref<16x16xf32, #tpu.memory_space<vmem>>, vector<16x16xf32>
    %c0_1 = arith.constant 0 : index
    %c0_2 = arith.constant 0 : index
    %1 = vector.load %arg2[%c0_1, %c0_2] : memref<16x32xf32, #tpu.memory_space<vmem>>, vector<16x32xf32>
    %cst = arith.constant dense<0.000000e+00> : vector<16x32xf32>
    %2 = tpu.matmul %0, %1, %cst {dimension_numbers = #tpu.dot_dimension_numbers<[1], [0], [0], [1], [0, 0, 1, 1], [], []>} : vector<16x16xf32>, vector<16x32xf32>, vector<16x32xf32> -> vector<16x32xf32>
    %c0_3 = arith.constant 0 : index
    %c0_4 = arith.constant 0 : index
    %3 = vector.load %arg3[%c0_3, %c0_4] : memref<16x32xf32, #tpu.memory_space<vmem>>, vector<16x32xf32>
    %cst_5 = arith.constant dense<0.000000e+00> : vector<16x32xf32>
    %4 = tpu.matmul %0, %3, %cst_5 {dimension_numbers = #tpu.dot_dimension_numbers<[1], [0], [0], [1], [0, 0, 1, 1], [], []>} : vector<16x16xf32>, vector<16x32xf32>, vector<16x32xf32> -> vector<16x32xf32>
    %5 = arith.negf %2 : vector<16x32xf32>
    %6 = math.exp %5 : vector<16x32xf32>
    %cst_6 = arith.constant 1.000000e+00 : f32
    %7 = vector.broadcast %cst_6 : f32 to vector<16x32xf32>
    %8 = arith.addf %7, %6 : vector<16x32xf32>
    %9 = arith.divf %7, %8 : vector<16x32xf32>
    %10 = arith.mulf %2, %9 : vector<16x32xf32>
    %11 = arith.mulf %10, %4 : vector<16x32xf32>
    %c0_7 = arith.constant 0 : index
    %c0_8 = arith.constant 0 : index
    %12 = vector.load %arg4[%c0_7, %c0_8] : memref<32x16xf32, #tpu.memory_space<vmem>>, vector<32x16xf32>
    %cst_9 = arith.constant dense<0.000000e+00> : vector<16x16xf32>
    %13 = tpu.matmul %11, %12, %cst_9 {dimension_numbers = #tpu.dot_dimension_numbers<[1], [0], [0], [1], [0, 0, 1, 1], [], []>} : vector<16x32xf32>, vector<32x16xf32>, vector<16x16xf32> -> vector<16x16xf32>
    %c0_10 = arith.constant 0 : index
    %c0_11 = arith.constant 0 : index
    %14 = vector.load %arg5[%c0_10, %c0_11] : memref<16x16xf32, #tpu.memory_space<vmem>>, vector<16x16xf32>
    tpu.vector_store %arg5[%c0_10, %c0_11], %13 {strides = array<i32>} : memref<16x16xf32, #tpu.memory_space<vmem>>, vector<16x16xf32>,
    return
  }
  func.func @transform_0(%arg0: i32) -> (i32, i32) {
    %c0_i32 = arith.constant 0 : i32
    %c0_i32_0 = arith.constant 0 : i32
    return %arg0, %c0_i32 : i32, i32
  }
  func.func @transform_1(%arg0: i32) -> (i32, i32) {
    %c0_i32 = arith.constant 0 : i32
    %c0_i32_0 = arith.constant 0 : i32
    %c0_i32_1 = arith.constant 0 : i32
    return %c0_i32, %c0_i32_0 : i32, i32
  }
  func.func @transform_2(%arg0: i32) -> (i32, i32) {
    %c0_i32 = arith.constant 0 : i32
    %c0_i32_0 = arith.constant 0 : i32
    %c0_i32_1 = arith.constant 0 : i32
    return %c0_i32, %c0_i32_0 : i32, i32
  }
  func.func @transform_3(%arg0: i32) -> (i32, i32) {
    %c0_i32 = arith.constant 0 : i32
    %c0_i32_0 = arith.constant 0 : i32
    %c0_i32_1 = arith.constant 0 : i32
    return %c0_i32, %c0_i32_0 : i32, i32
  }
  func.func @transform_4(%arg0: i32) -> (i32, i32) {
    %c0_i32 = arith.constant 0 : i32
    %c0_i32_0 = arith.constant 0 : i32
    return %arg0, %c0_i32 : i32, i32
  }
}

</mosaic_0001>

<bundles_post_ra>
// kernel: toy_model_forward_prepared.1
= control target key start
LH: loop header
LB: loop body
LE: loop exit
PB: predicated region body
PF: predicated region fallthrough
CT: control target
= control target key end

     0   :  { %vm21_vm0 = vcmask 130048   ;;  %vm200_vm1 = vcmask 261120   ;;  %s426_s1 = inlined_call_operand.vmem [shape: f32[16,32], index: 1, kind: input, shape index: {}]   ;;  %s427_s0 = inlined_call_operand.vmem [shape: f32[16,16], index: 0, kind: input, shape index: {}]   ;;  %s428_s2 = inlined_call_operand.vmem [shape: f32[16,32], index: 2, kind: input, shape index: {}]   ;;  %s429_s3 = inlined_call_operand.vmem [shape: f32[32,16], index: 3, kind: input, shape index: {}]   ;;  %s430_s4 = inlined_call_operand.vmem [shape: f32[16,16], index: 4, kind: output, shape index: {}]  }
   0x1   :  { %v19_v0 = vld [vmem:[%s426_s1] sm:$0xff]  ;;  %v20_v1 = vld [vmem:[%s426_s1 + $0x8] sm:$0xff]  ;;  %v198_v11 = vld [vmem:[%s429_s3 + $0x10] sm:$0xff] }
   0x2   :  { %v17_v2 = vld [vmem:[%s427_s0] sm:$0xff]  ;;  %v335_v3 = vpack.c.bf16 %v20_v1, %v19_v0  ;;  %v104_v5 = vld [vmem:[%s428_s2 + $0x8] sm:$0xff]  ;;  %v199_v12 = vld [vmem:[%s429_s3 + $0x18] sm:$0xff] }
   0x3   :  { %314 = vmatprep.mubr.msk.f32.mxu1 %vm21_vm0, %v17_v2  ;;  %v103_v4 = vld [vmem:[%s428_s2] sm:$0xff]  ;;  %v18_v7 = vld [vmem:[%s427_s0 + $0x8] sm:$0xff]  ;;  %v347_v13 = vpack.c.bf16 %v199_v12, %v198_v11 }
   0x4   :  { %v339_v6 = vpack.c.bf16 %v104_v5, %v103_v4  ;;  %336 = vmatprep.subr.bf16.mxu1 %v335_v3  ;;  %v196_v8 = vld [vmem:[%s429_s3] sm:$0xff]  ;;  %v197_v9 = vld [vmem:[%s429_s3 + $0x8] sm:$0xff] }
   0x5   :  { %338 = vmatpush3.bf16.msra.mxu1 %v335_v3  ;;  %v343_v10 = vpack.c.bf16 %v197_v9, %v196_v8 }
   0x6   :  { %340 = vmatprep.subr.bf16.mxu1 %v339_v6 }
   0x7   :  { %344 = vmatprep.subr.bf16.mxu0 %v343_v10 }
   0x8   :  { %315 = vmatmul.mubr.msk.f32.vlgmr.msra.gmra.mrb[0].mxu1 %vm21_vm0, %v18_v7  ;;  %346 = vmatpush3.bf16.msra.mxu0 %v343_v10 }
   0x9   :  { %342 = vmatpush3.bf16.msra.mxu1 %v339_v6  ;;  %321 = vmatprep.mubr.msk.f32.mxu1 %vm21_vm0, %v17_v2 }
   0xa   :  { %348 = vmatprep.subr.bf16.mxu0 %v347_v13 }
   0xc   :  { %322 = vmatmul.mubr.msk.f32.vlgmr.msra.gmra.mrb[2].mxu1 %vm21_vm0, %v18_v7  ;;  %350 = vmatpush3.bf16.msra.mxu0 %v347_v13 }
  0xdb   :  { %v316_v14 = vpop.f32.mrb[0].mxu1 }
  0xdc   :  { %v293_v15 = vmul.f32 -1.442695, %v316_v14  ;;  %v94_v16 = vpop.f32.mrb[1].mxu1 }
  0xdd   :  { %v292_v17 = vmul.f32 -1.442695, %v94_v16 }
  0xde   :  { %351 = vpow2.f32 %v293_v15 }
  0xdf   :  { %353 = vpow2.f32 %v292_v17  ;;  %v323_v18 = vpop.f32.mrb[2].mxu1 }
  0xe0   :  { %v171_v19 = vpop.f32.mrb[3].mxu1 }
  0xe8   :  { %v352_v20 = vpop.eup %351 }
  0xe9   :  { %v354_v21 = vpop.eup %353  ;;  %v187_v22 = vadd.f32 1.0, %v352_v20 }
  0xea   :  { %v186_v23 = vadd.f32 1.0, %v354_v21 }
  0xeb   :  { %355 = vrcp.f32 %v187_v22 }
  0xec   :  { %357 = vrcp.f32 %v186_v23 }
  0xf5   :  { %v356_v24 = vpop.eup %355 }
  0xf6   :  { %v358_v25 = vpop.eup %357  ;;  %v193_v26 = vmul.f32 %v356_v24, %v316_v14 }
  0xf7   :  { %v192_v27 = vmul.f32 %v358_v25, %v94_v16 }
  0xf8   :  { %v195_v28 = vmul.f32 %v323_v18, %v193_v26 }
  0xf9   :  { %v194_v29 = vmul.f32 %v192_v27, %v171_v19 }
  0xfb   :  { %332 = vmatprep.mubr.msk.f32.mxu0 %vm200_vm1, %v194_v29 }
  0xfc   :  { %333 = vmatmul.mubr.msk.f32.vlgmr.msra.gmra.mrb[0].mxu0 %vm200_vm1, %v195_v28 }
 0x1cf   :  { %v334_v30 = vpop.f32.mrb[0].mxu0 }
 0x1d0   :  { %283 = vst.msk [vmem:[%s430_s4 + $0x8] sm:$0xff] %vm21_vm0, %v334_v30  ;;  %v273_v31 = vpop.f32.mrb[1].mxu0 }
 0x1d1   :  { %282 = vst.msk [vmem:[%s430_s4] sm:$0xff] %vm21_vm0, %v273_v31 }

</bundles_post_ra>
